<compile_context>
chip_gen: v5e
topology: v5e:2x2
jax: 0.10.0
libtpu: 0.0.40
codegen_flags: <defaults>
</compile_context>

<pallas_src>
import math

import numpy as np
import jax
import jax.numpy as jnp
from jax.experimental import pallas as pl
from jax.experimental.pallas import tpu as pltpu


def _make_sig_kernel(C, W, dt, pad0, pad1, pad2):
    """Depth-2 windowed path-signature + fused linear projection.

    x_ref  : (C, X)            data channels, X = block_rows * T on lanes
    tbl_ref: (3W+3+pad0, X)    rows = [mask(W), vt(W), ht(W), S1_t, S2_tt, 1, 0..]
    w_ref  : (out, R)          Linear weight, columns permuted/zero-padded to the
                               scratch row order (bias folded into the `ones` row)
    o_ref  : (out, X)
    sig_ref: (R, X)            VMEM scratch: assembled, 8-row-aligned signature
    """
    nxx = C * C
    sec0 = C + 3 + pad0            # [S1_x(C), S1_t, S2_tt, ones, pad]
    sec1 = nxx + pad1              # dense S2[x_a, x_b]
    sec2 = 2 * C + pad2            # S2[x_a, t], S2[t, x_b]

    def kernel(x_ref, tbl_ref, w_ref, o_ref, sig_ref):
        X = x_ref.shape[1]
        x = x_ref[...]                                         # (C, X)

        prev = jnp.zeros((C, X), jnp.float32)                  # running data point
        s2xx = jnp.zeros((nxx, X), jnp.float32)                # dense S2[x_a, x_b]
        s2xt = jnp.zeros((C, X), jnp.float32)                  # S2[x_a, t]
        s2tx = jnp.zeros((C, X), jnp.float32)                  # S2[t, x_b]

        # Chen identity, fully unrolled over the static window slots. Clamped
        # window points have mask == 0, i.e. exactly-zero increments, so edge
        # frames (and lane wrap-around from the roll) match the reference.
        for m in range(W):
            s = m - dt
            # q[:, l] == x[:, l + s]  (np.roll semantics => shift = -s)
            q = x if s == 0 else pltpu.roll(x, (-s) % X, 1)
            mask = jnp.broadcast_to(tbl_ref[m:m + 1, :], (C, X))
            vt = jnp.broadcast_to(tbl_ref[W + m:W + m + 1, :], (C, X))
            ht = jnp.broadcast_to(tbl_ref[2 * W + m:2 * W + m + 1, :], (C, X))

            v = (q - prev) * mask                              # masked increment
            half = prev + 0.5 * v                              # Chen "half" point
            # dense update: row a*C+b += half[a] * v[b]   (one full-vreg mul+add)
            half_rep = jnp.concatenate(
                [jnp.broadcast_to(half[a:a + 1, :], (C, X)) for a in range(C)],
                axis=0)                                        # repeat pattern
            v_til = jnp.concatenate([v] * C, axis=0)           # tile pattern
            s2xx = s2xx + half_rep * v_til
            s2xt = s2xt + half * vt
            s2tx = s2tx + ht * v
            prev = prev + v

        # Assemble the padded signature with 8-row aligned stores, then ONE
        # fused MXU dot; the bias rides on the `ones` row of the table.
        consts = tbl_ref[3 * W:3 * W + 3 + pad0, :]            # [S1_t, S2_tt, 1, 0..]
        sig_ref[0:sec0, :] = jnp.concatenate([prev, consts], axis=0)
        if pad1:
            s2xx = jnp.concatenate(
                [s2xx, jnp.zeros((pad1, X), jnp.float32)], axis=0)
        sig_ref[sec0:sec0 + sec1, :] = s2xx
        tail = [s2xt, s2tx]
        if pad2:
            tail.append(jnp.zeros((pad2, X), jnp.float32))
        sig_ref[sec0 + sec1:sec0 + sec1 + sec2, :] = jnp.concatenate(tail, axis=0)

        o_ref[...] = jnp.dot(w_ref[...], sig_ref[...],
                             preferred_element_type=jnp.float32)

    return kernel


def _choose_block_rows(B, T, target_lanes=1024, min_steps=2, pref_steps=4):
    """Block rows s.t. block lanes (bb*T) are a multiple of 128, blocks carry
    ~target_lanes lanes, and the grid has >= 2 (ideally >= pref_steps) steps."""
    m = 128 // math.gcd(T, 128)                   # bb must be a multiple of m
    bb = max(m, (target_lanes // T) // m * m)
    # prefer >= pref_steps grid steps while keeping blocks >= 256 lanes
    while bb > m and (bb - m) * T >= 256 and -(-B // bb) < pref_steps:
        bb -= m
    # always guarantee >= min_steps when the batch allows it (megacore)
    while bb > m and -(-B // bb) < min_steps:
        bb -= m
    return bb


def sig_module_forward(x, w_lin, b_lin, *, win_size=5, block_rows=None,
                       target_lanes=1024):
    """x: (N, C, J, T) float32.  Returns (N, out_dim, J, T) float32."""
    N, C, J, T = x.shape
    D = C + 1
    out_dim, sig_ch = w_lin.shape
    assert sig_ch == D + D * D, "kernel implements sig_depth == 2 only"
    dt = (win_size - 1) // 2
    assert dt < T, "window half-width must be smaller than the time length"
    W = 2 * dt + 1                                # effective window slots
    B = N * J

    bb = _choose_block_rows(B, T, target_lanes) if block_rows is None else block_rows
    B_pad = -(-B // bb) * bb
    X = bb * T

    # padded / 8-row-aligned signature layout
    pad0 = (-(C + 3)) % 8
    pad1 = (-(C * C)) % 8
    pad2 = (-(2 * C)) % 8
    sec0 = C + 3 + pad0
    sec1 = C * C + pad1
    sec2 = 2 * C + pad2
    R = sec0 + sec1 + sec2                        # 32 for C == 4

    # --- host precompute: per-slot time channel, validity mask -------------
    t = np.arange(T)
    idx = t[:, None] + np.arange(W)[None, :] - dt              # (T, W) unclipped
    start = np.maximum(t - dt, 0)
    end = np.minimum(t + dt + 1, T)
    denom = np.maximum(end - start - 1, 1).astype(np.float64)
    tval = (np.clip(idx, 0, T - 1) - start[:, None]) / denom[:, None]   # (T, W)
    tprev = np.concatenate([np.zeros((T, 1)), tval[:, :-1]], axis=1)
    vt = tval - tprev                                           # time increments
    ht = tprev + 0.5 * vt                                       # time "half" values
    valid = ((idx >= 0) & (idx <= T - 1)).astype(np.float64)    # unclamped steps
    s1t = tval[:, -1]                                           # S1 time component
    s2tt = np.sum(ht * vt, axis=1)                              # S2[t, t]

    def tile_w(a):                                              # (T, W) -> (W, X)
        return np.tile(np.ascontiguousarray(a.T), (1, bb))

    def tile_r(a):                                              # (T,)  -> (X,)
        return np.tile(a, bb)

    tbl = np.concatenate(
        [tile_w(valid), tile_w(vt), tile_w(ht),
         tile_r(s1t)[None], tile_r(s2tt)[None], np.ones((1, X)),
         np.zeros((pad0, X))],
        axis=0).astype(np.float32)                              # (3W+3+pad0, X)

    # --- weight columns permuted / zero-padded to scratch order, bias folded
    wl = np.asarray(w_lin, np.float32)
    bl = np.asarray(b_lin, np.float32)
    w_pad = np.zeros((out_dim, R), np.float32)
    w_pad[:, 0:C] = wl[:, 0:C]                                  # S1 (data)
    w_pad[:, C] = wl[:, C]                                      # S1 (time)
    w_pad[:, C + 1] = wl[:, D + C * D + C]                      # S2[t, t]
    w_pad[:, C + 2] = bl                                        # bias (ones row)
    for a in range(C):                                          # S2[x_a, x_b]
        w_pad[:, sec0 + a * C: sec0 + (a + 1) * C] = wl[:, D + a * D: D + a * D + C]
    o2 = sec0 + sec1
    w_pad[:, o2:o2 + C] = wl[:, D + np.arange(C) * D + C]       # S2[x_a, t]
    w_pad[:, o2 + C:o2 + 2 * C] = wl[:, D + C * D: D + C * D + C]   # S2[t, x_b]

    # --- channel-major, batch*time flattened input, padded to bb rows ------
    xr = jnp.transpose(jnp.asarray(x, jnp.float32), (1, 0, 2, 3)).reshape(C, B, T)
    if B_pad != B:
        xr = jnp.pad(xr, ((0, 0), (0, B_pad - B), (0, 0)))
    x2d = xr.reshape(C, B_pad * T)

    n_tbl = tbl.shape[0]
    out = pl.pallas_call(
        _make_sig_kernel(C, W, dt, pad0, pad1, pad2),
        out_shape=jax.ShapeDtypeStruct((out_dim, B_pad * T), jnp.float32),
        grid_spec=pltpu.PrefetchScalarGridSpec(
            num_scalar_prefetch=0,
            grid=(B_pad // bb,),
            in_specs=[
                pl.BlockSpec((C, X), lambda i: (0, i)),
                pl.BlockSpec((n_tbl, X), lambda i: (0, 0)),
                pl.BlockSpec((out_dim, R), lambda i: (0, 0)),
            ],
            out_specs=pl.BlockSpec((out_dim, X), lambda i: (0, i)),
            scratch_shapes=[pltpu.VMEM((R, X), jnp.float32)],
        ),
        compiler_params=pltpu.CompilerParams(dimension_semantics=("parallel",)),
    )(x2d, jnp.asarray(tbl), jnp.asarray(w_pad))

    out = out[:, :B * T].reshape(out_dim, N, J, T)
    return jnp.transpose(out, (1, 0, 2, 3))


def _reference(x, w_lin, b_lin, win_size):
    """Pure-numpy mirror of the PyTorch double loop (depth-2 signature)."""
    x = np.asarray(x, np.float64)
    N, C, J, T = x.shape
    D = C + 1
    out_dim = w_lin.shape[0]
    dt = (win_size - 1) // 2
    res = np.zeros((N, out_dim, J, T))
    for i in range(J):
        for j in range(T):
            s, e = max(j - dt, 0), min(j + dt + 1, T)
            stream = np.transpose(x[:, :, i, s:e], (0, 2, 1))                 # (N, L, C)
            L = e - s
            time = np.linspace(0.0, 1.0, L)
            path = np.concatenate(
                [stream, np.broadcast_to(time[None, :, None], (N, L, 1))], axis=-1)
            path = np.concatenate([np.zeros((N, 1, D)), path], axis=1)        # basepoint
            inc = path[:, 1:] - path[:, :-1]
            prev = np.zeros((N, D))
            S2 = np.zeros((N, D, D))
            for k in range(L):
                v = inc[:, k]
                S2 += prev[:, :, None] * v[:, None, :] + 0.5 * v[:, :, None] * v[:, None, :]
                prev += v
            sig = np.concatenate([prev, S2.reshape(N, D * D)], axis=-1)
            res[:, :, i, j] = sig @ np.asarray(w_lin, np.float64).T + np.asarray(b_lin, np.float64)
    return res


if __name__ == "__main__":
    # SigModule(in_channels=4, sig_in_channels=4, out_dimension=32, sig_depth=2,
    #           win_size=5, use_bottleneck=False)
    N, C, J, T = 2, 4, 16, 16
    out_dim, win_size = 32, 5
    D = C + 1
    sig_ch = D + D * D          # signatory.signature_channels(C + 1, depth=2) = 30

    key = jax.random.PRNGKey(0)
    kx, kw, kb = jax.random.split(key, 3)
    x = jax.random.normal(kx, (N, C, J, T), jnp.float32)
    bound = 1.0 / np.sqrt(sig_ch)
    w_lin = jax.random.uniform(kw, (out_dim, sig_ch), jnp.float32, -bound, bound)
    b_lin = jax.random.uniform(kb, (out_dim,), jnp.float32, -bound, bound)

    res = sig_module_forward(x, w_lin, b_lin, win_size=win_size)
    res = jax.block_until_ready(res)
    assert res.shape == (N, out_dim, J, T)

    ref = _reference(np.asarray(x), np.asarray(w_lin), np.asarray(b_lin), win_size)
    err = float(np.max(np.abs(np.asarray(res, np.float64) - ref)))
    assert err < 1e-3, f"max abs error {err}"
    print("KERNEL_OK")
</pallas_src>

<mosaic_0001>
module attributes {stable_mosaic.version = 11 : i64} {
  func.func @kernel(%arg0: i32, %arg1: memref<4x256xf32, #tpu.memory_space<vmem>>, %arg2: memref<19x256xf32, #tpu.memory_space<vmem>>, %arg3: memref<32x32xf32, #tpu.memory_space<vmem>>, %arg4: memref<32x256xf32, #tpu.memory_space<vmem>>, %arg5: memref<32x256xf32, #tpu.memory_space<vmem>>) attributes {dimension_semantics = [#tpu.dimension_semantics<parallel>], iteration_bounds = array<i64: 2>, scalar_prefetch = 0 : i64, scratch_operands = 1 : i64, tpu.core_type = #tpu.core_type<tc>, window_params = [{transform_indices = @transform_0, window_bounds = array<i64: 4, 256>}, {pipeline_mode = #tpu.pipeline_mode<synchronous>, transform_indices = @transform_1, window_bounds = array<i64: 19, 256>}, {pipeline_mode = #tpu.pipeline_mode<synchronous>, transform_indices = @transform_2, window_bounds = array<i64: 32, 32>}, {transform_indices = @transform_3, window_bounds = array<i64: 32, 256>}]} {
    %c0 = arith.constant 0 : index
    %c0_0 = arith.constant 0 : index
    %0 = vector.load %arg1[%c0, %c0_0] : memref<4x256xf32, #tpu.memory_space<vmem>>, vector<4x256xf32>
    %cst = arith.constant 0.000000e+00 : f32
    %1 = vector.broadcast %cst : f32 to vector<4x256xf32>
    %cst_1 = arith.constant 0.000000e+00 : f32
    %2 = vector.broadcast %cst_1 : f32 to vector<16x256xf32>
    %cst_2 = arith.constant 0.000000e+00 : f32
    %3 = vector.broadcast %cst_2 : f32 to vector<4x256xf32>
    %cst_3 = arith.constant 0.000000e+00 : f32
    %4 = vector.broadcast %cst_3 : f32 to vector<4x256xf32>
    %c2_i32 = arith.constant 2 : i32
    %5 = tpu.dynamic_rotate %0 by %c2_i32 dim 1 : vector<4x256xf32>, i32 -> vector<4x256xf32>
    %c0_4 = arith.constant 0 : index
    %c0_5 = arith.constant 0 : index
    %6 = vector.load %arg2[%c0_4, %c0_5] : memref<19x256xf32, #tpu.memory_space<vmem>>, vector<1x256xf32>
    %7 = vector.shape_cast %6 : vector<1x256xf32> to vector<1x256xf32>
    %8 = vector.broadcast %7 : vector<1x256xf32> to vector<4x256xf32>
    %c5 = arith.constant 5 : index
    %c0_6 = arith.constant 0 : index
    %9 = vector.load %arg2[%c5, %c0_6] : memref<19x256xf32, #tpu.memory_space<vmem>>, vector<1x256xf32>
    %10 = vector.shape_cast %9 : vector<1x256xf32> to vector<1x256xf32>
    %11 = vector.broadcast %10 : vector<1x256xf32> to vector<4x256xf32>
    %c10 = arith.constant 10 : index
    %c0_7 = arith.constant 0 : index
    %12 = vector.load %arg2[%c10, %c0_7] : memref<19x256xf32, #tpu.memory_space<vmem>>, vector<1x256xf32>
    %13 = vector.shape_cast %12 : vector<1x256xf32> to vector<1x256xf32>
    %14 = vector.broadcast %13 : vector<1x256xf32> to vector<4x256xf32>
    %15 = arith.subf %5, %1 : vector<4x256xf32>
    %16 = arith.mulf %15, %8 : vector<4x256xf32>
    %cst_8 = arith.constant 5.000000e-01 : f32
    %17 = vector.broadcast %cst_8 : f32 to vector<4x256xf32>
    %18 = arith.mulf %17, %16 : vector<4x256xf32>
    %19 = arith.addf %1, %18 : vector<4x256xf32>
    %20 = vector.extract_strided_slice %19 {offsets = [0, 0], sizes = [1, 256], strides = [1, 1]} : vector<4x256xf32> to vector<1x256xf32>
    %21 = vector.shape_cast %20 : vector<1x256xf32> to vector<1x256xf32>
    %22 = vector.broadcast %21 : vector<1x256xf32> to vector<4x256xf32>
    %23 = vector.extract_strided_slice %19 {offsets = [1, 0], sizes = [1, 256], strides = [1, 1]} : vector<4x256xf32> to vector<1x256xf32>
    %24 = vector.shape_cast %23 : vector<1x256xf32> to vector<1x256xf32>
    %25 = vector.broadcast %24 : vector<1x256xf32> to vector<4x256xf32>
    %26 = vector.extract_strided_slice %19 {offsets = [2, 0], sizes = [1, 256], strides = [1, 1]} : vector<4x256xf32> to vector<1x256xf32>
    %27 = vector.shape_cast %26 : vector<1x256xf32> to vector<1x256xf32>
    %28 = vector.broadcast %27 : vector<1x256xf32> to vector<4x256xf32>
    %29 = vector.extract_strided_slice %19 {offsets = [3, 0], sizes = [1, 256], strides = [1, 1]} : vector<4x256xf32> to vector<1x256xf32>
    %30 = vector.shape_cast %29 : vector<1x256xf32> to vector<1x256xf32>
    %31 = vector.broadcast %30 : vector<1x256xf32> to vector<4x256xf32>
    %32 = tpu.concatenate %22, %25, %28, %31 in 0 : vector<4x256xf32>, vector<4x256xf32>, vector<4x256xf32>, vector<4x256xf32> -> vector<16x256xf32>
    %33 = tpu.concatenate %16, %16, %16, %16 in 0 : vector<4x256xf32>, vector<4x256xf32>, vector<4x256xf32>, vector<4x256xf32> -> vector<16x256xf32>
    %34 = arith.mulf %32, %33 : vector<16x256xf32>
    %35 = arith.addf %2, %34 : vector<16x256xf32>
    %36 = arith.mulf %19, %11 : vector<4x256xf32>
    %37 = arith.addf %3, %36 : vector<4x256xf32>
    %38 = arith.mulf %14, %16 : vector<4x256xf32>
    %39 = arith.addf %4, %38 : vector<4x256xf32>
    %40 = arith.addf %1, %16 : vector<4x256xf32>
    %c1_i32 = arith.constant 1 : i32
    %41 = tpu.dynamic_rotate %0 by %c1_i32 dim 1 : vector<4x256xf32>, i32 -> vector<4x256xf32>
    %c1 = arith.constant 1 : index
    %c0_9 = arith.constant 0 : index
    %42 = vector.load %arg2[%c1, %c0_9] : memref<19x256xf32, #tpu.memory_space<vmem>>, vector<1x256xf32>
    %43 = vector.shape_cast %42 : vector<1x256xf32> to vector<1x256xf32>
    %44 = vector.broadcast %43 : vector<1x256xf32> to vector<4x256xf32>
    %c6 = arith.constant 6 : index
    %c0_10 = arith.constant 0 : index
    %45 = vector.load %arg2[%c6, %c0_10] : memref<19x256xf32, #tpu.memory_space<vmem>>, vector<1x256xf32>
    %46 = vector.shape_cast %45 : vector<1x256xf32> to vector<1x256xf32>
    %47 = vector.broadcast %46 : vector<1x256xf32> to vector<4x256xf32>
    %c11 = arith.constant 11 : index
    %c0_11 = arith.constant 0 : index
    %48 = vector.load %arg2[%c11, %c0_11] : memref<19x256xf32, #tpu.memory_space<vmem>>, vector<1x256xf32>
    %49 = vector.shape_cast %48 : vector<1x256xf32> to vector<1x256xf32>
    %50 = vector.broadcast %49 : vector<1x256xf32> to vector<4x256xf32>
    %51 = arith.subf %41, %40 : vector<4x256xf32>
    %52 = arith.mulf %51, %44 : vector<4x256xf32>
    %cst_12 = arith.constant 5.000000e-01 : f32
    %53 = vector.broadcast %cst_12 : f32 to vector<4x256xf32>
    %54 = arith.mulf %53, %52 : vector<4x256xf32>
    %55 = arith.addf %40, %54 : vector<4x256xf32>
    %56 = vector.extract_strided_slice %55 {offsets = [0, 0], sizes = [1, 256], strides = [1, 1]} : vector<4x256xf32> to vector<1x256xf32>
    %57 = vector.shape_cast %56 : vector<1x256xf32> to vector<1x256xf32>
    %58 = vector.broadcast %57 : vector<1x256xf32> to vector<4x256xf32>
    %59 = vector.extract_strided_slice %55 {offsets = [1, 0], sizes = [1, 256], strides = [1, 1]} : vector<4x256xf32> to vector<1x256xf32>
    %60 = vector.shape_cast %59 : vector<1x256xf32> to vector<1x256xf32>
    %61 = vector.broadcast %60 : vector<1x256xf32> to vector<4x256xf32>
    %62 = vector.extract_strided_slice %55 {offsets = [2, 0], sizes = [1, 256], strides = [1, 1]} : vector<4x256xf32> to vector<1x256xf32>
    %63 = vector.shape_cast %62 : vector<1x256xf32> to vector<1x256xf32>
    %64 = vector.broadcast %63 : vector<1x256xf32> to vector<4x256xf32>
    %65 = vector.extract_strided_slice %55 {offsets = [3, 0], sizes = [1, 256], strides = [1, 1]} : vector<4x256xf32> to vector<1x256xf32>
    %66 = vector.shape_cast %65 : vector<1x256xf32> to vector<1x256xf32>
    %67 = vector.broadcast %66 : vector<1x256xf32> to vector<4x256xf32>
    %68 = tpu.concatenate %58, %61, %64, %67 in 0 : vector<4x256xf32>, vector<4x256xf32>, vector<4x256xf32>, vector<4x256xf32> -> vector<16x256xf32>
    %69 = tpu.concatenate %52, %52, %52, %52 in 0 : vector<4x256xf32>, vector<4x256xf32>, vector<4x256xf32>, vector<4x256xf32> -> vector<16x256xf32>
    %70 = arith.mulf %68, %69 : vector<16x256xf32>
    %71 = arith.addf %35, %70 : vector<16x256xf32>
    %72 = arith.mulf %55, %47 : vector<4x256xf32>
    %73 = arith.addf %37, %72 : vector<4x256xf32>
    %74 = arith.mulf %50, %52 : vector<4x256xf32>
    %75 = arith.addf %39, %74 : vector<4x256xf32>
    %76 = arith.addf %40, %52 : vector<4x256xf32>
    %c2 = arith.constant 2 : index
    %c0_13 = arith.constant 0 : index
    %77 = vector.load %arg2[%c2, %c0_13] : memref<19x256xf32, #tpu.memory_space<vmem>>, vector<1x256xf32>
    %78 = vector.shape_cast %77 : vector<1x256xf32> to vector<1x256xf32>
    %79 = vector.broadcast %78 : vector<1x256xf32> to vector<4x256xf32>
    %c7 = arith.constant 7 : index
    %c0_14 = arith.constant 0 : index
    %80 = vector.load %arg2[%c7, %c0_14] : memref<19x256xf32, #tpu.memory_space<vmem>>, vector<1x256xf32>
    %81 = vector.shape_cast %80 : vector<1x256xf32> to vector<1x256xf32>
    %82 = vector.broadcast %81 : vector<1x256xf32> to vector<4x256xf32>
    %c12 = arith.constant 12 : index
    %c0_15 = arith.constant 0 : index
    %83 = vector.load %arg2[%c12, %c0_15] : memref<19x256xf32, #tpu.memory_space<vmem>>, vector<1x256xf32>
    %84 = vector.shape_cast %83 : vector<1x256xf32> to vector<1x256xf32>
    %85 = vector.broadcast %84 : vector<1x256xf32> to vector<4x256xf32>
    %86 = arith.subf %0, %76 : vector<4x256xf32>
    %87 = arith.mulf %86, %79 : vector<4x256xf32>
    %cst_16 = arith.constant 5.000000e-01 : f32
    %88 = vector.broadcast %cst_16 : f32 to vector<4x256xf32>
    %89 = arith.mulf %88, %87 : vector<4x256xf32>
    %90 = arith.addf %76, %89 : vector<4x256xf32>
    %91 = vector.extract_strided_slice %90 {offsets = [0, 0], sizes = [1, 256], strides = [1, 1]} : vector<4x256xf32> to vector<1x256xf32>
    %92 = vector.shape_cast %91 : vector<1x256xf32> to vector<1x256xf32>
    %93 = vector.broadcast %92 : vector<1x256xf32> to vector<4x256xf32>
    %94 = vector.extract_strided_slice %90 {offsets = [1, 0], sizes = [1, 256], strides = [1, 1]} : vector<4x256xf32> to vector<1x256xf32>
    %95 = vector.shape_cast %94 : vector<1x256xf32> to vector<1x256xf32>
    %96 = vector.broadcast %95 : vector<1x256xf32> to vector<4x256xf32>
    %97 = vector.extract_strided_slice %90 {offsets = [2, 0], sizes = [1, 256], strides = [1, 1]} : vector<4x256xf32> to vector<1x256xf32>
    %98 = vector.shape_cast %97 : vector<1x256xf32> to vector<1x256xf32>
    %99 = vector.broadcast %98 : vector<1x256xf32> to vector<4x256xf32>
    %100 = vector.extract_strided_slice %90 {offsets = [3, 0], sizes = [1, 256], strides = [1, 1]} : vector<4x256xf32> to vector<1x256xf32>
    %101 = vector.shape_cast %100 : vector<1x256xf32> to vector<1x256xf32>
    %102 = vector.broadcast %101 : vector<1x256xf32> to vector<4x256xf32>
    %103 = tpu.concatenate %93, %96, %99, %102 in 0 : vector<4x256xf32>, vector<4x256xf32>, vector<4x256xf32>, vector<4x256xf32> -> vector<16x256xf32>
    %104 = tpu.concatenate %87, %87, %87, %87 in 0 : vector<4x256xf32>, vector<4x256xf32>, vector<4x256xf32>, vector<4x256xf32> -> vector<16x256xf32>
    %105 = arith.mulf %103, %104 : vector<16x256xf32>
    %106 = arith.addf %71, %105 : vector<16x256xf32>
    %107 = arith.mulf %90, %82 : vector<4x256xf32>
    %108 = arith.addf %73, %107 : vector<4x256xf32>
    %109 = arith.mulf %85, %87 : vector<4x256xf32>
    %110 = arith.addf %75, %109 : vector<4x256xf32>
    %111 = arith.addf %76, %87 : vector<4x256xf32>
    %c255_i32 = arith.constant 255 : i32
    %112 = tpu.dynamic_rotate %0 by %c255_i32 dim 1 : vector<4x256xf32>, i32 -> vector<4x256xf32>
    %c3 = arith.constant 3 : index
    %c0_17 = arith.constant 0 : index
    %113 = vector.load %arg2[%c3, %c0_17] : memref<19x256xf32, #tpu.memory_space<vmem>>, vector<1x256xf32>
    %114 = vector.shape_cast %113 : vector<1x256xf32> to vector<1x256xf32>
    %115 = vector.broadcast %114 : vector<1x256xf32> to vector<4x256xf32>
    %c8 = arith.constant 8 : index
    %c0_18 = arith.constant 0 : index
    %116 = vector.load %arg2[%c8, %c0_18] : memref<19x256xf32, #tpu.memory_space<vmem>>, vector<1x256xf32>
    %117 = vector.shape_cast %116 : vector<1x256xf32> to vector<1x256xf32>
    %118 = vector.broadcast %117 : vector<1x256xf32> to vector<4x256xf32>
    %c13 = arith.constant 13 : index
    %c0_19 = arith.constant 0 : index
    %119 = vector.load %arg2[%c13, %c0_19] : memref<19x256xf32, #tpu.memory_space<vmem>>, vector<1x256xf32>
    %120 = vector.shape_cast %119 : vector<1x256xf32> to vector<1x256xf32>
    %121 = vector.broadcast %120 : vector<1x256xf32> to vector<4x256xf32>
    %122 = arith.subf %112, %111 : vector<4x256xf32>
    %123 = arith.mulf %122, %115 : vector<4x256xf32>
    %cst_20 = arith.constant 5.000000e-01 : f32
    %124 = vector.broadcast %cst_20 : f32 to vector<4x256xf32>
    %125 = arith.mulf %124, %123 : vector<4x256xf32>
    %126 = arith.addf %111, %125 : vector<4x256xf32>
    %127 = vector.extract_strided_slice %126 {offsets = [0, 0], sizes = [1, 256], strides = [1, 1]} : vector<4x256xf32> to vector<1x256xf32>
    %128 = vector.shape_cast %127 : vector<1x256xf32> to vector<1x256xf32>
    %129 = vector.broadcast %128 : vector<1x256xf32> to vector<4x256xf32>
    %130 = vector.extract_strided_slice %126 {offsets = [1, 0], sizes = [1, 256], strides = [1, 1]} : vector<4x256xf32> to vector<1x256xf32>
    %131 = vector.shape_cast %130 : vector<1x256xf32> to vector<1x256xf32>
    %132 = vector.broadcast %131 : vector<1x256xf32> to vector<4x256xf32>
    %133 = vector.extract_strided_slice %126 {offsets = [2, 0], sizes = [1, 256], strides = [1, 1]} : vector<4x256xf32> to vector<1x256xf32>
    %134 = vector.shape_cast %133 : vector<1x256xf32> to vector<1x256xf32>
    %135 = vector.broadcast %134 : vector<1x256xf32> to vector<4x256xf32>
    %136 = vector.extract_strided_slice %126 {offsets = [3, 0], sizes = [1, 256], strides = [1, 1]} : vector<4x256xf32> to vector<1x256xf32>
    %137 = vector.shape_cast %136 : vector<1x256xf32> to vector<1x256xf32>
    %138 = vector.broadcast %137 : vector<1x256xf32> to vector<4x256xf32>
    %139 = tpu.concatenate %129, %132, %135, %138 in 0 : vector<4x256xf32>, vector<4x256xf32>, vector<4x256xf32>, vector<4x256xf32> -> vector<16x256xf32>
    %140 = tpu.concatenate %123, %123, %123, %123 in 0 : vector<4x256xf32>, vector<4x256xf32>, vector<4x256xf32>, vector<4x256xf32> -> vector<16x256xf32>
    %141 = arith.mulf %139, %140 : vector<16x256xf32>
    %142 = arith.addf %106, %141 : vector<16x256xf32>
    %143 = arith.mulf %126, %118 : vector<4x256xf32>
    %144 = arith.addf %108, %143 : vector<4x256xf32>
    %145 = arith.mulf %121, %123 : vector<4x256xf32>
    %146 = arith.addf %110, %145 : vector<4x256xf32>
    %147 = arith.addf %111, %123 : vector<4x256xf32>
    %c254_i32 = arith.constant 254 : i32
    %148 = tpu.dynamic_rotate %0 by %c254_i32 dim 1 : vector<4x256xf32>, i32 -> vector<4x256xf32>
    %c4 = arith.constant 4 : index
    %c0_21 = arith.constant 0 : index
    %149 = vector.load %arg2[%c4, %c0_21] : memref<19x256xf32, #tpu.memory_space<vmem>>, vector<1x256xf32>
    %150 = vector.shape_cast %149 : vector<1x256xf32> to vector<1x256xf32>
    %151 = vector.broadcast %150 : vector<1x256xf32> to vector<4x256xf32>
    %c9 = arith.constant 9 : index
    %c0_22 = arith.constant 0 : index
    %152 = vector.load %arg2[%c9, %c0_22] : memref<19x256xf32, #tpu.memory_space<vmem>>, vector<1x256xf32>
    %153 = vector.shape_cast %152 : vector<1x256xf32> to vector<1x256xf32>
    %154 = vector.broadcast %153 : vector<1x256xf32> to vector<4x256xf32>
    %c14 = arith.constant 14 : index
    %c0_23 = arith.constant 0 : index
    %155 = vector.load %arg2[%c14, %c0_23] : memref<19x256xf32, #tpu.memory_space<vmem>>, vector<1x256xf32>
    %156 = vector.shape_cast %155 : vector<1x256xf32> to vector<1x256xf32>
    %157 = vector.broadcast %156 : vector<1x256xf32> to vector<4x256xf32>
    %158 = arith.subf %148, %147 : vector<4x256xf32>
    %159 = arith.mulf %158, %151 : vector<4x256xf32>
    %cst_24 = arith.constant 5.000000e-01 : f32
    %160 = vector.broadcast %cst_24 : f32 to vector<4x256xf32>
    %161 = arith.mulf %160, %159 : vector<4x256xf32>
    %162 = arith.addf %147, %161 : vector<4x256xf32>
    %163 = vector.extract_strided_slice %162 {offsets = [0, 0], sizes = [1, 256], strides = [1, 1]} : vector<4x256xf32> to vector<1x256xf32>
    %164 = vector.shape_cast %163 : vector<1x256xf32> to vector<1x256xf32>
    %165 = vector.broadcast %164 : vector<1x256xf32> to vector<4x256xf32>
    %166 = vector.extract_strided_slice %162 {offsets = [1, 0], sizes = [1, 256], strides = [1, 1]} : vector<4x256xf32> to vector<1x256xf32>
    %167 = vector.shape_cast %166 : vector<1x256xf32> to vector<1x256xf32>
    %168 = vector.broadcast %167 : vector<1x256xf32> to vector<4x256xf32>
    %169 = vector.extract_strided_slice %162 {offsets = [2, 0], sizes = [1, 256], strides = [1, 1]} : vector<4x256xf32> to vector<1x256xf32>
    %170 = vector.shape_cast %169 : vector<1x256xf32> to vector<1x256xf32>
    %171 = vector.broadcast %170 : vector<1x256xf32> to vector<4x256xf32>
    %172 = vector.extract_strided_slice %162 {offsets = [3, 0], sizes = [1, 256], strides = [1, 1]} : vector<4x256xf32> to vector<1x256xf32>
    %173 = vector.shape_cast %172 : vector<1x256xf32> to vector<1x256xf32>
    %174 = vector.broadcast %173 : vector<1x256xf32> to vector<4x256xf32>
    %175 = tpu.concatenate %165, %168, %171, %174 in 0 : vector<4x256xf32>, vector<4x256xf32>, vector<4x256xf32>, vector<4x256xf32> -> vector<16x256xf32>
    %176 = tpu.concatenate %159, %159, %159, %159 in 0 : vector<4x256xf32>, vector<4x256xf32>, vector<4x256xf32>, vector<4x256xf32> -> vector<16x256xf32>
    %177 = arith.mulf %175, %176 : vector<16x256xf32>
    %178 = arith.addf %142, %177 : vector<16x256xf32>
    %179 = arith.mulf %162, %154 : vector<4x256xf32>
    %180 = arith.addf %144, %179 : vector<4x256xf32>
    %181 = arith.mulf %157, %159 : vector<4x256xf32>
    %182 = arith.addf %146, %181 : vector<4x256xf32>
    %183 = arith.addf %147, %159 : vector<4x256xf32>
    %c15 = arith.constant 15 : index
    %c0_25 = arith.constant 0 : index
    %184 = vector.load %arg2[%c15, %c0_25] : memref<19x256xf32, #tpu.memory_space<vmem>>, vector<4x256xf32>
    %185 = tpu.concatenate %183, %184 in 0 : vector<4x256xf32>, vector<4x256xf32> -> vector<8x256xf32>
    %c0_26 = arith.constant 0 : index
    %c0_27 = arith.constant 0 : index
    %186 = vector.load %arg5[%c0_26, %c0_27] : memref<32x256xf32, #tpu.memory_space<vmem>>, vector<8x256xf32>
    tpu.vector_store %arg5[%c0_26, %c0_27], %185 {strides = array<i32>} : memref<32x256xf32, #tpu.memory_space<vmem>>, vector<8x256xf32>,
    %c8_28 = arith.constant 8 : index
    %c0_29 = arith.constant 0 : index
    %187 = vector.load %arg5[%c8_28, %c0_29] : memref<32x256xf32, #tpu.memory_space<vmem>>, vector<16x256xf32>
    tpu.vector_store %arg5[%c8_28, %c0_29], %178 {strides = array<i32>} : memref<32x256xf32, #tpu.memory_space<vmem>>, vector<16x256xf32>,
    %188 = tpu.concatenate %180, %182 in 0 : vector<4x256xf32>, vector<4x256xf32> -> vector<8x256xf32>
    %c24 = arith.constant 24 : index
    %c0_30 = arith.constant 0 : index
    %189 = vector.load %arg5[%c24, %c0_30] : memref<32x256xf32, #tpu.memory_space<vmem>>, vector<8x256xf32>
    tpu.vector_store %arg5[%c24, %c0_30], %188 {strides = array<i32>} : memref<32x256xf32, #tpu.memory_space<vmem>>, vector<8x256xf32>,
    %c0_31 = arith.constant 0 : index
    %c0_32 = arith.constant 0 : index
    %190 = vector.load %arg3[%c0_31, %c0_32] : memref<32x32xf32, #tpu.memory_space<vmem>>, vector<32x32xf32>
    %c0_33 = arith.constant 0 : index
    %c0_34 = arith.constant 0 : index
    %191 = vector.load %arg5[%c0_33, %c0_34] : memref<32x256xf32, #tpu.memory_space<vmem>>, vector<32x256xf32>
    %cst_35 = arith.constant dense<0.000000e+00> : vector<32x256xf32>
    %192 = tpu.matmul %190, %191, %cst_35 {dimension_numbers = #tpu.dot_dimension_numbers<[1], [0], [0], [1], [0, 0, 1, 1], [], []>} : vector<32x32xf32>, vector<32x256xf32>, vector<32x256xf32> -> vector<32x256xf32>
    %c0_36 = arith.constant 0 : index
    %c0_37 = arith.constant 0 : index
    %193 = vector.load %arg4[%c0_36, %c0_37] : memref<32x256xf32, #tpu.memory_space<vmem>>, vector<32x256xf32>
    tpu.vector_store %arg4[%c0_36, %c0_37], %192 {strides = array<i32>} : memref<32x256xf32, #tpu.memory_space<vmem>>, vector<32x256xf32>,
    return
  }
  func.func @transform_0(%arg0: i32) -> (i32, i32) {
    %c0_i32 = arith.constant 0 : i32
    %c0_i32_0 = arith.constant 0 : i32
    return %c0_i32, %arg0 : i32, i32
  }
  func.func @transform_1(%arg0: i32) -> (i32, i32) {
    %c0_i32 = arith.constant 0 : i32
    %c0_i32_0 = arith.constant 0 : i32
    %c0_i32_1 = arith.constant 0 : i32
    return %c0_i32, %c0_i32_0 : i32, i32
  }
  func.func @transform_2(%arg0: i32) -> (i32, i32) {
    %c0_i32 = arith.constant 0 : i32
    %c0_i32_0 = arith.constant 0 : i32
    %c0_i32_1 = arith.constant 0 : i32
    return %c0_i32, %c0_i32_0 : i32, i32
  }
  func.func @transform_3(%arg0: i32) -> (i32, i32) {
    %c0_i32 = arith.constant 0 : i32
    %c0_i32_0 = arith.constant 0 : i32
    return %c0_i32, %arg0 : i32, i32
  }
}

</mosaic_0001>

<bundles_post_ra>
// kernel: tpu_custom_call.1
= control target key start
LH: loop header
LB: loop body
LE: loop exit
PB: predicated region body
PF: predicated region fallthrough
CT: control target
= control target key end

     0   :  { %8 = vsyncpa [#allocation4], 0  ;;  %s1471_s0 = inlined_call_operand.hbm [shape: f32[4,512], index: 0, kind: input, shape index: {}]   ;;  %s1472_s1 = inlined_call_operand.hbm [shape: f32[19,256], index: 1, kind: input, shape index: {}]   ;;  %s1473_s2 = inlined_call_operand.hbm [shape: f32[32,32], index: 2, kind: input, shape index: {}]   ;;  %s1474_s3 = inlined_call_operand.hbm [shape: f32[32,512], index: 3, kind: output, shape index: {}]  }
   0x1   :  { %10 = vsyncpa [#allocation4 + $0x1], 0 }
   0x2   :  { %11 = vsyncpa [#allocation7], 0 }
   0x3   :  { %12 = vsyncpa [#allocation5], 0 }
   0x4   :  { %14 = vsyncpa [#allocation5 + $0x1], 0  ;;  %s1190_s12 = smov 0   ;;  %s1192_s13 = smov 0  }
   0x5   :  { %s1194_s14 = smov 0   ;;  %s1196_s15 = smov 0  }
   0x6 LB: > { %s130_s18 = sshll.u32 %s1472_s1, 4  ;;  %s1214_s19 = sadd.s32 4294967295, %s1155_s15   ;;  %s1155_s15 = sphi %s1196_s15, %s1485_s15   ;;  %s1151_s14 = sphi %s1194_s14, %s1484_s14   ;;  %s1147_s13 = sphi %s1192_s13, %s1483_s13   ;;  %s1143_s12 = sphi %s1190_s12, %s1482_s12   ;;  %s131_s18 = int_to_ptr.hbm [resolvable:$true] %s130_s18 }
   0x7   : > { %p882_p0 = scmp.ge.s32.totalorder %s1155_s15, 1  ;;  %p41_p1 = scmp.eq.s32.totalorder %s1214_s19, 0 }
   0x8   : > { %p119_p2 = scmp.lt.s32.totalorder %s1155_s15, 3  ;;  %s1157_s21 = smov [#allocation6]  }
   0x9   : > { %s132_s22 = sshll.u32 %s1157_s21, 4  ;;  %s144_s25 = sshll.u32 %s1473_s2, 4  ;;  %s133_s22 = int_to_ptr.vmem [resolvable:$true] %s132_s22  ;;  %s145_s25 = int_to_ptr.hbm [resolvable:$true] %s144_s25 }
   0xa   : > { %p1219_p3 = pnand %p882_p0, %p119_p2  ;;  %s1158_s26 = smov [#allocation8]  }
   0xb   : > { %s146_s27 = sshll.u32 %s1158_s26, 4  ;;  %s1159_s28 = smov 256   ;;  %s147_s27 = int_to_ptr.vmem [resolvable:$true] %s146_s27 }
   0xc   : > { %p929_p4 = pneg %p1219_p3  ;;  %s1160_s29 = smov 16  }
   0xd   : > { %s1161_s30 = smov 128   ;;  %s1162_s4 = smov 8  }
   0xe   : > { %p930_p6 = pnand %p929_p4, %p41_p1  ;;  %s881_s5 = sadd.s32 4294967294, %s1155_s15  }
   0xf   : > { %s1233_s6 = sadd.s32 1, %s1155_s15   ;;  %s27_s8 = sadd.s32 1, %s1151_s14 }
  0x10   : > { %932 = dma.hbm_to_vmem [thread:$0]  (!%p930_p6), %s131_s18, 768, %s133_s22, [#allocation7], %s1159_s28, %s1159_s28, %s1160_s29  }
  0x11   : > { %935 = dma.hbm_to_vmem [thread:$0]  (!%p930_p6), %s145_s25, 512, %s147_s27, [#allocation7], %s1161_s30, %s1161_s30, %s1162_s4  }
  0x12   : > { %s24_s7 = ssub.s32 %s1155_s15, %s1233_s6  ;;  %p34_p8 = scmp.ne.s32.totalorder %s1151_s14, %s1147_s13 }
  0x13   : > { %p25_p7 = scmp.eq.s32.totalorder %s24_s7, 0  ;;  %p35_p9 = scmp.eq.s32.totalorder %s1155_s15, 0 }
  0x14   : > { %p40_p10 = scmp.ne.s32.totalorder %s1147_s13, %s1143_s12  ;;  %p106_p13 = scmp.eq.s32.totalorder %s1214_s19, 1 }
  0x15   : > { %s1244_s9 = scalar_select %p25_p7, %s1151_s14, %s27_s8  }
  0x16   : > { %p1246_p11 = por %p35_p9, %p34_p8  ;;  %p1252_p12 = por %p41_p1, %p40_p10 }
  0x17   : > { %p112_p0 = scmp.eq.s32.totalorder %s881_s5, 1  ;;  %p946_p2 = scmp.lt.s32.totalorder %s1155_s15, 2 }
  0x18   : > { %s160_s16 = sand.u32 1, %s1151_s14   ;;  %p1259_p4 = por %p106_p13, %p34_p8 }
  0x19   : > { %p1263_p6 = por %p112_p0, %p40_p10  ;;  %s886_s21 = sshll.u32 %s160_s16, 3 }
  0x1a   : > { %s907_s22 = sshll.u32 %s1155_s15, 3  ;;  %s164_s26 = scalar_lea.vmem [#allocation3], %s886_s21 }
  0x1b   : > { %s169_s25 = scalar_lea.hbm %s1471_s0, %s907_s22  ;;  %s173_s27 = sshll.u32 %s164_s26, 4  ;;  %s174_s27 = int_to_ptr.vmem [resolvable:$true] %s173_s27 }
  0x1c   : > { %s171_s28 = sshll.u32 %s169_s25, 4  ;;  %p1273_p7 = pnand %p946_p2, %p1246_p11  ;;  %s172_s28 = int_to_ptr.hbm [resolvable:$true] %s171_s28 }
  0x1d   : > { %s161_s30 = scalar_lea.sflag [#allocation4], %s160_s16  ;;  %s1055_s4 = sshra.s32 %s172_s28, 4  ;;  %s1056_s4 = int_to_ptr.hbm [resolvable:$true] %s1055_s4 }
  0x1e   : > { %s1057_s5 = scalar_lea.hbm %s1056_s4, 8  ;;  %p1059_p9 = pneg %p1273_p7 }
  0x1f   : > { %p1058_p8 = scmp.ne.s32.totalorder %s1056_s4, %s1057_s5  ;;  %s1062_s21 = scalar_lea.hbm %s1471_s0, 16 }
  0x20   : > { %p1063_p11 = scmp.lt.s32.totalorder %s1056_s4, %s1471_s0  ;;  %p1064_p0 = scmp.lt.s32.totalorder %s1062_s21, %s1057_s5 }
  0x21   : > { %p1060_p10 = pnand %p1059_p9, %p1058_p8 }
  0x22   : > { %p1065_p2 = por %p1064_p0, %p1063_p11 }
  0x23   : > { %p1061_p13 = pneg %p1060_p10 }
  0x25   : > { %p1066_p5 = pnand %p1065_p2, %p1061_p13 }
  0x27   : > { %1069 = shalt.err (!%p1066_p5)
}
  0x28   : > { %939 = dma.hbm_to_vmem [thread:$0]  (!%p1273_p7), %s172_s28, 128, %s174_s27, %s161_s30  }
  0x29   : > { %182 = sbr.rel (%p1219_p3) target bundleno = 562 (0x232), region = 32  ;;  %s1290_s16 = sand.u32 (!%p1219_p3), 1, %s1147_s13  }
  0x2a   : > { %s890_s23 = sshll.u32 (!%p1219_p3), %s1290_s16, 3  ;;  %s185_s24 = scalar_lea.sflag (!%p1219_p3), [#allocation4], %s1290_s16 }
  0x2b   : > { %s188_s25 = scalar_lea.vmem (!%p1219_p3), [#allocation3], %s890_s23 }
  0x2e   : > { %1130 = dma.done.wait (%p1252_p12), %s185_s24, 128  }
  0x2f   : > { %1132 = vsyncadd (%p1252_p12), %s185_s24, 4294967168 }
  0x30   : > { %1134 = dma.done.wait (%p41_p1), [#allocation7], 1280  }
  0x31   : > { %1136 = vsyncadd (%p41_p1), [#allocation7], 4294966016  ;;  %v1302_v0 = vld [vmem:[%s188_s25] sm:$0xff]  ;;  %s1163_s20 = smov 2   ;;  %s1164_s11 = smov 1   ;;  %v235_v5 = vlaneseq  ;;  %vm274_vm1 = vcmask 1043456  }
  0x32   : > { %226 = vst [vmem:[#allocation1] ss:$2 sm:$0xff] %v1302_v0  ;;  %v240_v8 = vld [vmem:[#allocation6] ss:$8 sm:$0x3]  ;;  %s1165_s26 = smov 127  }
  0x33   : > { %v1306_v7 = vand.u32 127, %v235_v5  ;;  %v385_v9 = vld [vmem:[#allocation6 + $0x2] ss:$8 sm:$0x3]  ;;  %v242_v10 = vperm.slane %v240_v8, 0  ;;  %v243_v11 = vperm.slane %v240_v8, 1 }
  0x34   : > { %v388_v12 = vperm.slane %v385_v9, 1  ;;  %v318_v15 = vld [vmem:[#allocation6 + $0x1] ss:$8 sm:$0x3]  ;;  %v387_v21 = vperm.slane %v385_v9, 0  ;;  %s1166_s27 = smov 126  }
  0x35   : > { %vm237_vm0 = vcmp.lt.s32.totalorder %v1306_v7, 2  ;;  %v247_v18 = vld [vmem:[#allocation6 + $0x5] ss:$8 sm:$0x3]  ;;  %vm314_vm2 = vcmp.lt.s32.totalorder %v1306_v7, 1  ;;  %v320_v24 = vperm.slane %v318_v15, 0 }
  0x36   : > { %v409_v22 = vrot.slane %v388_v12, 4  ;;  %v254_v23 = vld [vmem:[#allocation6 + $0x12] ss:$8 sm:$0x3]  ;;  %v321_v26 = vperm.slane %v318_v15, 1  ;;  %v249_v30 = vperm.slane %v247_v18, 0 }
  0x37   : > { %v332_v25 = vld [vmem:[#allocation6 + $0x13] ss:$8 sm:$0x3]  ;;  %v325_v28 = vld [vmem:[#allocation6 + $0x6] ss:$8 sm:$0x3] }
  0x38   : > { %v256_v31 = vperm.slane %v254_v23, 0  ;;  %v250_v32 = vperm.slane %v247_v18, 1  ;;  %v257_v33 = vperm.slane %v254_v23, 1  ;;  %v410_v34 = vsel %vm274_vm1, %v387_v21, %v409_v22  ;;  %s893_s28 = sshll.u32 %s1290_s16, 6  ;;  %s908_s30 = sshll.u32 %s1214_s19, 4 }
  0x39   : > { %v227_v1 = vld.sshfl [vmem:[#allocation1] sm:$0xff pattern:$0x75316420]  ;;  %v228_v2 = vld.sshfl [vmem:[#allocation1 + $0x8] sm:$0xff pattern:$0x75316420]  ;;  %s785_s7 = scalar_lea.hbm %s1474_s3, %s908_s30 }
  0x3a   : > { %231 = vrot.lane.b32.xlu0 %v227_v1, %s1163_s20  ;;  %305 = vst [vmem:[#allocation1] ss:$2 sm:$0xff] %v1302_v0  ;;  %v334_v35 = vperm.slane %v332_v25, 0  ;;  %v327_v38 = vperm.slane %v325_v28, 0  ;;  %v335_v39 = vperm.slane %v332_v25, 1  ;;  %v328_v43 = vperm.slane %v325_v28, 1 }
  0x3b   : > { %vm498_vm3 = vcmp.lt.s32.totalorder %v1306_v7, 127  ;;  %vm577_vm4 = vcmp.lt.s32.totalorder %v1306_v7, 126  ;;  %vm655_vm5 = vcmask 1044480   ;;  %vm694_vm6 = vcmask 261120   ;;  %s221_s29 = scalar_lea.vmem [#allocation9], %s893_s28  ;;  %s788_s21 = sshll.u32 %s785_s7, 4  ;;  %s789_s21 = int_to_ptr.hbm [resolvable:$true] %s788_s21 }
  0x3c   : > { %s786_s8 = sshll.u32 %s221_s29, 4  ;;  %s774_s19 = scalar_lea.sflag [#allocation5], %s1290_s16  ;;  %s787_s8 = int_to_ptr.vmem [resolvable:$true] %s786_s8 }
  0x3d   : > { %s1099_s22 = sshra.s32 %s789_s21, 4  ;;  %s1105_s25 = scalar_lea.hbm %s1474_s3, 128  ;;  %s1100_s22 = int_to_ptr.hbm [resolvable:$true] %s1099_s22 }
  0x3e   : > { %s1101_s10 = scalar_lea.hbm %s1100_s22, 64  ;;  %p1106_p12 = scmp.lt.s32.totalorder %s1100_s22, %s1474_s3 }
  0x3f   : > { %p1102_p1 = scmp.ne.s32.totalorder %s1100_s22, %s1101_s10  ;;  %p1107_p7 = scmp.lt.s32.totalorder %s1105_s25, %s1101_s10 }
  0x41   : > { %v306_v3 = vld.sshfl [vmem:[#allocation1] sm:$0xff pattern:$0x75316420]  ;;  %v307_v4 = vld.sshfl [vmem:[#allocation1 + $0x8] sm:$0xff pattern:$0x75316420]  ;;  %p1103_p3 = pnand %p1102_p1, %p1259_p4  ;;  %p1108_p8 = por %p1107_p7, %p1106_p12 }
  0x42   : > { %233 = vrot.lane.b32.xlu0 %v228_v2, %s1163_s20  ;;  %310 = vrot.lane.b32.xlu1 %v306_v3, %s1164_s11 }
  0x43   : > { %p1104_p5 = pneg %p1103_p3 }
  0x45   : > { %p1109_p9 = pnand %p1108_p8, %p1104_p5 }
  0x4a   : > { %312 = vrot.lane.b32.xlu1 %v307_v4, %s1164_s11 }
  0xac   : > { %v232_v6 = vpop.permute.xlu0 %231 }
  0xb4   : > { %v234_v13 = vpop.permute.xlu0 %233  ;;  %v311_v14 = vpop.permute.xlu1 %310 }
  0xb5   : > { %v238_v16 = vsel %vm237_vm0, %v232_v6, %v234_v13  ;;  %v239_v17 = vsel %vm237_vm0, %v234_v13, %v232_v6 }
  0xb6   : > { %v260_v19 = vmul.f32 %v242_v10, %v239_v17  ;;  %v261_v20 = vmul.f32 %v243_v11, %v238_v16 }
  0xb8   : > { %v262_v27 = vmul.f32 0.5, %v260_v19  ;;  %v263_v29 = vmul.f32 0.5, %v261_v20  ;;  %v281_v45 = vrot.slane %v260_v19, 4  ;;  %v282_v46 = vrot.slane %v261_v20, 4 }
  0xb9   : > { %v299_v56 = vmul.f32 %v260_v19, %v256_v31  ;;  %v300_v57 = vmul.f32 %v261_v20, %v257_v33 }
  0xba   : > { %v270_v36 = vperm.slane %v262_v27, 2  ;;  %v272_v37 = vperm.slane %v262_v27, 3  ;;  %v271_v40 = vperm.slane %v263_v29, 2  ;;  %v273_v41 = vperm.slane %v263_v29, 3 }
  0xbb   : > { %v266_v49 = vperm.slane %v262_v27, 0  ;;  %v268_v50 = vperm.slane %v262_v27, 1  ;;  %v267_v54 = vperm.slane %v263_v29, 0  ;;  %v295_v55 = vmul.f32 %v262_v27, %v249_v30 }
  0xbc   : > { %v313_v42 = vpop.permute.xlu1 %312  ;;  %v277_v44 = vsel %vm274_vm1, %v270_v36, %v272_v37  ;;  %v278_v53 = vsel %vm274_vm1, %v271_v40, %v273_v41  ;;  %v269_v58 = vperm.slane %v263_v29, 1  ;;  %v285_v61 = vsel %vm274_vm1, %v260_v19, %v281_v45 }
  0xbd   : > { %v315_v47 = vsel %vm314_vm2, %v311_v14, %v313_v42  ;;  %v316_v48 = vsel %vm314_vm2, %v313_v42, %v311_v14  ;;  %v286_v62 = vsel %vm274_vm1, %v261_v20, %v282_v46  ;;  %v296_v63 = vmul.f32 %v263_v29, %v250_v32 }
  0xbe   : > { %v338_v51 = vsub.f32 %v316_v48, %v260_v19  ;;  %v339_v52 = vsub.f32 %v315_v47, %v261_v20  ;;  %v289_v1 = vmul.f32 %v285_v61, %v277_v44  ;;  %v290_v2 = vmul.f32 %v286_v62, %v278_v53 }
  0xbf   : > { %v275_v3 = vsel %vm274_vm1, %v266_v49, %v268_v50  ;;  %v276_v8 = vsel %vm274_vm1, %v267_v54, %v269_v58 }
  0xc0   : > { %v340_v59 = vmul.f32 %v338_v51, %v320_v24  ;;  %v341_v60 = vmul.f32 %v339_v52, %v321_v26  ;;  %v288_v48 = vmul.f32 %v286_v62, %v276_v8  ;;  %v390_v51 = vld [vmem:[#allocation6 + $0x7] ss:$8 sm:$0x3] }
  0xc1   : > { %v392_v52 = vperm.slane %v390_v51, 0  ;;  %v393_v53 = vperm.slane %v390_v51, 1 }
  0xc2   : > { %v342_v4 = vmul.f32 0.5, %v340_v59  ;;  %v343_v5 = vmul.f32 0.5, %v341_v60  ;;  %v1320_v6 = vadd.f32 %v341_v60, %v261_v20  ;;  %v378_v9 = vmul.f32 %v340_v59, %v334_v35 }
  0xc3   : > { %v379_v10 = vmul.f32 %v341_v60, %v335_v39  ;;  %v360_v11 = vrot.slane %v340_v59, 4  ;;  %v361_v12 = vrot.slane %v341_v60, 4  ;;  %v1323_v15 = vadd.f32 %v340_v59, %v260_v19 }
  0xc4   : > { %v344_v13 = vadd.f32 %v342_v4, %v260_v19  ;;  %v345_v14 = vadd.f32 %v343_v5, %v261_v20  ;;  %v405_v16 = vrot.slane %v1320_v6, 4  ;;  %v1326_v17 = vadd.f32 %v378_v9, %v299_v56 }
  0xc5   : > { %v1328_v18 = vadd.f32 %v379_v10, %v300_v57  ;;  %v364_v21 = vsel %vm274_vm1, %v340_v59, %v360_v11  ;;  %v365_v22 = vsel %vm274_vm1, %v341_v60, %v361_v12 }
  0xc6   : > { %v406_v23 = vsel %vm274_vm1, %v1323_v15, %v405_v16  ;;  %v374_v24 = vmul.f32 %v344_v13, %v327_v38  ;;  %v375_v25 = vmul.f32 %v345_v14, %v328_v43  ;;  %v350_v26 = vperm.slane %v344_v13, 2 }
  0xc7   : > { %v408_v20 = vsub.f32 %v1302_v0, %v406_v23  ;;  %v352_v19 = vperm.slane %v344_v13, 3  ;;  %v351_v27 = vperm.slane %v345_v14, 2  ;;  %v353_v28 = vperm.slane %v345_v14, 3 }
  0xc8   : > { %v376_v29 = vadd.f32 %v374_v24, %v295_v55  ;;  %v377_v30 = vadd.f32 %v375_v25, %v296_v63  ;;  %v346_v31 = vperm.slane %v344_v13, 0  ;;  %v348_v32 = vperm.slane %v344_v13, 1 }
  0xc9   : > { %v1335_v33 = vmul.f32 %v410_v34, %v408_v20  ;;  %v356_v35 = vsel %vm274_vm1, %v350_v26, %v352_v19  ;;  %v357_v36 = vsel %vm274_vm1, %v351_v27, %v353_v28  ;;  %v347_v37 = vperm.slane %v345_v14, 0 }
  0xca   : > { %v368_v39 = vmul.f32 %v364_v21, %v356_v35  ;;  %v369_v38 = vmul.f32 %v365_v22, %v357_v36  ;;  %v354_v40 = vsel %vm274_vm1, %v346_v31, %v348_v32  ;;  %v349_v41 = vperm.slane %v345_v14, 1  ;;  %v397_v32 = vld [vmem:[#allocation6 + $0x14] ss:$8 sm:$0x3] }
  0xcb   : > { %v413_v42 = vmul.f32 0.5, %v1335_v33  ;;  %v287_v43 = vmul.f32 %v285_v61, %v275_v3  ;;  %v366_v44 = vmul.f32 %v364_v21, %v354_v40  ;;  %v400_v40 = vperm.slane %v397_v32, 1 }
  0xcc   : > { %v372_v45 = vadd.f32 %v368_v39, %v289_v1  ;;  %v373_v46 = vadd.f32 %v369_v38, %v290_v2  ;;  %v355_v47 = vsel %vm274_vm1, %v347_v37, %v349_v41  ;;  %v399_v38 = vperm.slane %v397_v32, 0 }
  0xcd   : > { %415 = vst [vmem:[#allocation1] ss:$2 sm:$0xff] %v413_v42  ;;  %v370_v34 = vadd.f32 %v366_v44, %v287_v43  ;;  %v367_v49 = vmul.f32 %v365_v22, %v355_v47 }
  0xcf   : > { %v371_v50 = vadd.f32 %v367_v49, %v288_v48 }
  0xd4   : > { %v416_v54 = vld.sshfl [vmem:[#allocation1] sm:$0xff pattern:$0x75316420]  ;;  %v417_v55 = vld.sshfl [vmem:[#allocation1 + $0x8] sm:$0xff pattern:$0x75316420] }
  0xd5   : > { %v420_v56 = vadd.f32 %v416_v54, %v1323_v15  ;;  %v421_v57 = vadd.f32 %v417_v55, %v1320_v6  ;;  %435 = vst [vmem:[#allocation1] ss:$2 sm:$0xff] %v1335_v33  ;;  %v516_v55 = vld [vmem:[#allocation6 + $0x15] ss:$8 sm:$0x3] }
  0xd7   : > { %v469_v58 = vmul.f32 %v420_v56, %v392_v52  ;;  %v470_v59 = vmul.f32 %v421_v57, %v393_v53  ;;  %v422_v1 = vperm.slane %v420_v56, 0  ;;  %v424_v2 = vperm.slane %v420_v56, 1 }
  0xd8   : > { %v423_v3 = vperm.slane %v421_v57, 0  ;;  %v425_v4 = vperm.slane %v421_v57, 1  ;;  %v426_v24 = vperm.slane %v420_v56, 2  ;;  %v428_v25 = vperm.slane %v420_v56, 3 }
  0xd9   : > { %v1345_v60 = vadd.f32 %v469_v58, %v376_v29  ;;  %v1347_v61 = vadd.f32 %v470_v59, %v377_v30  ;;  %v430_v9 = vsel %vm274_vm1, %v422_v1, %v424_v2  ;;  %v427_v26 = vperm.slane %v421_v57, 2  ;;  %v509_v59 = vld [vmem:[#allocation6 + $0x10] ss:$8 sm:$0x3] }
  0xda   : > { %v431_v11 = vsel %vm274_vm1, %v423_v3, %v425_v4  ;;  %v429_v20 = vperm.slane %v421_v57, 3  ;;  %v432_v28 = vsel %vm274_vm1, %v426_v24, %v428_v25 }
  0xdc   : > { %v436_v62 = vld.sshfl [vmem:[#allocation1] sm:$0xff pattern:$0x75316420]  ;;  %v437_v63 = vld.sshfl [vmem:[#allocation1 + $0x8] sm:$0xff pattern:$0x75316420]  ;;  %v433_v30 = vsel %vm274_vm1, %v427_v26, %v429_v20 }
  0xdd   : > { %441 = vst [vmem:[#allocation1 + $0x1] ss:$2 sm:$0xff] %v1335_v33 }
  0xe4   : > { %v442_v5 = vld.sshfl [vmem:[#allocation1] sm:$0xff pattern:$0x75316420]  ;;  %v443_v8 = vld.sshfl [vmem:[#allocation1 + $0x8] sm:$0xff pattern:$0x75316420] }
  0xe5   : > { %446 = vst [vmem:[#allocation1] ss:$2 sm:$0xff] %v1335_v33  ;;  %v457_v10 = vsel %vm274_vm1, %v436_v62, %v442_v5  ;;  %v458_v12 = vsel %vm274_vm1, %v437_v63, %v443_v8  ;;  %v518_v62 = vperm.slane %v516_v55, 0  ;;  %v519_v63 = vperm.slane %v516_v55, 1 }
  0xe6   : > { %v461_v13 = vmul.f32 %v457_v10, %v430_v9  ;;  %v462_v14 = vmul.f32 %v458_v12, %v431_v11  ;;  %v511_v5 = vperm.slane %v509_v59, 0  ;;  %v512_v8 = vperm.slane %v509_v59, 1 }
  0xe8   : > { %v1355_v16 = vadd.f32 %v461_v13, %v370_v34  ;;  %v1357_v21 = vadd.f32 %v462_v14, %v371_v50 }
  0xec   : > { %v447_v22 = vld.sshfl [vmem:[#allocation1] sm:$0xff pattern:$0x75316420]  ;;  %v448_v23 = vld.sshfl [vmem:[#allocation1 + $0x8] sm:$0xff pattern:$0x75316420] }
  0xed   : > { %452 = vst [vmem:[#allocation1 + $0x1] ss:$2 sm:$0xff] %v1335_v33 }
  0xf4   : > { %v453_v19 = vld.sshfl [vmem:[#allocation1] sm:$0xff pattern:$0x75316420]  ;;  %v454_v27 = vld.sshfl [vmem:[#allocation1 + $0x8] sm:$0xff pattern:$0x75316420] }
  0xf5   : > { %473 = vst [vmem:[#allocation1] ss:$2 sm:$0xff] %v1335_v33  ;;  %v459_v29 = vsel %vm274_vm1, %v447_v22, %v453_v19  ;;  %v460_v31 = vsel %vm274_vm1, %v448_v23, %v454_v27 }
  0xf6   : > { %v463_v35 = vmul.f32 %v459_v29, %v432_v28  ;;  %v464_v36 = vmul.f32 %v460_v31, %v433_v30 }
  0xf8   : > { %v1365_v37 = vadd.f32 %v463_v35, %v372_v45  ;;  %v1367_v39 = vadd.f32 %v464_v36, %v373_v46 }
  0xfc   : > { %v474_v41 = vld.sshfl [vmem:[#allocation1] sm:$0xff pattern:$0x75316420]  ;;  %v475_v42 = vld.sshfl [vmem:[#allocation1 + $0x8] sm:$0xff pattern:$0x75316420] }
  0xfd   : > { %482 = vst [vmem:[#allocation1] ss:$2 sm:$0xff] %v1335_v33  ;;  %v478_v43 = vmul.f32 %v474_v41, %v399_v38  ;;  %v479_v44 = vmul.f32 %v475_v42, %v400_v40 }
  0xff   : > { %v480_v47 = vadd.f32 %v478_v43, %v1326_v17  ;;  %v481_v34 = vadd.f32 %v479_v44, %v1328_v18  ;;  %v502_v18 = vld [vmem:[#allocation6 + $0x3] ss:$8 sm:$0x3] }
 0x100   : > { %v505_v53 = vperm.slane %v502_v18, 1 }
 0x104   : > { %v483_v48 = vld.sshfl [vmem:[#allocation1] sm:$0xff pattern:$0x75316420]  ;;  %v484_v49 = vld.sshfl [vmem:[#allocation1 + $0x8] sm:$0xff pattern:$0x75316420] }
 0x105   : > { %489 = vst [vmem:[#allocation1] ss:$2 sm:$0xff] %v1302_v0  ;;  %v1374_v45 = vadd.f32 %v483_v48, %v1323_v15  ;;  %v488_v52 = vadd.f32 %v484_v49, %v1320_v6  ;;  %v504_v15 = vperm.slane %v502_v18, 0 }
 0x10c   : > { %v490_v46 = vld.sshfl [vmem:[#allocation1] sm:$0xff pattern:$0x75316420]  ;;  %v491_v50 = vld.sshfl [vmem:[#allocation1 + $0x8] sm:$0xff pattern:$0x75316420] }
 0x10d   : > { %494 = vrot.lane.b32.xlu2 %v490_v46, %s1165_s26  ;;  %568 = vst [vmem:[#allocation1] ss:$2 sm:$0xff] %v1302_v0  ;;  %v581_v46 = vld [vmem:[#allocation6 + $0x4] ss:$8 sm:$0x3] }
 0x114   : > { %v570_v33 = vld.sshfl [vmem:[#allocation1 + $0x8] sm:$0xff pattern:$0x75316420]  ;;  %v569_v51 = vld.sshfl [vmem:[#allocation1] sm:$0xff pattern:$0x75316420] }
 0x115   : > { %496 = vrot.lane.b32.xlu2 %v491_v50, %s1165_s26  ;;  %575 = vrot.lane.b32.xlu1 %v570_v33, %s1166_s27  ;;  %v595_v33 = vld [vmem:[#allocation6 + $0x16] ss:$8 sm:$0x3] }
 0x116   : > { %573 = vrot.lane.b32.xlu0 %v569_v51, %s1166_s27  ;;  %v597_v55 = vperm.slane %v595_v33, 0 }
 0x167   : > { %v495_v17 = vpop.permute.xlu2 %494 }
 0x16f   : > { %v497_v54 = vpop.permute.xlu2 %496 }
 0x170   : > { %v499_v56 = vsel %vm498_vm3, %v495_v17, %v497_v54  ;;  %v500_v57 = vsel %vm498_vm3, %v497_v54, %v495_v17  ;;  %v584_v17 = vperm.slane %v581_v46, 1  ;;  %v588_v54 = vld [vmem:[#allocation6 + $0x11] ss:$8 sm:$0x3] }
 0x171   : > { %v522_v0 = vsub.f32 %v499_v56, %v1374_v45  ;;  %v523_v58 = vsub.f32 %v500_v57, %v488_v52  ;;  %v598_v56 = vperm.slane %v595_v33, 1 }
 0x173   : > { %v524_v1 = vmul.f32 %v522_v0, %v504_v15  ;;  %v525_v2 = vmul.f32 %v523_v58, %v505_v53  ;;  %v647_v0 = vld [vmem:[#allocation6 + $0x10] sm:$0x80]  ;;  %v591_v58 = vperm.slane %v588_v54, 1 }
 0x175   : > { %v526_v3 = vmul.f32 0.5, %v524_v1  ;;  %v527_v4 = vmul.f32 0.5, %v525_v2  ;;  %v562_v9 = vmul.f32 %v524_v1, %v518_v62  ;;  %v563_v6 = vmul.f32 %v525_v2, %v519_v63 }
 0x176   : > { %v544_v10 = vrot.slane %v524_v1, 4  ;;  %v545_v11 = vrot.slane %v525_v2, 4  ;;  %v1402_v51 = vadd.f32 %v525_v2, %v488_v52 }
 0x177   : > { %v528_v12 = vadd.f32 %v526_v3, %v1374_v45  ;;  %v529_v13 = vadd.f32 %v527_v4, %v488_v52  ;;  %v564_v14 = vadd.f32 %v562_v9, %v480_v47  ;;  %v565_v22 = vadd.f32 %v563_v6, %v481_v34 }
 0x178   : > { %v548_v23 = vsel %vm274_vm1, %v524_v1, %v544_v10  ;;  %v549_v24 = vsel %vm274_vm1, %v525_v2, %v545_v11  ;;  %v590_v52 = vperm.slane %v588_v54, 0  ;;  %v656_v4 = vrot.slane %v647_v0, 3  ;;  %v683_v54 = vld [vmem:[#allocation8 + $0x8] sm:$0xff] }
 0x179   : > { %v558_v25 = vmul.f32 %v528_v12, %v511_v5  ;;  %v559_v26 = vmul.f32 %v529_v13, %v512_v8  ;;  %v534_v20 = vperm.slane %v528_v12, 2  ;;  %v536_v19 = vperm.slane %v528_v12, 3 }
 0x17a   : > { %v535_v27 = vperm.slane %v529_v13, 2  ;;  %v537_v28 = vperm.slane %v529_v13, 3  ;;  %v530_v29 = vperm.slane %v528_v12, 0  ;;  %v532_v30 = vperm.slane %v528_v12, 1 }
 0x17b   : > { %v560_v31 = vadd.f32 %v558_v25, %v1345_v60  ;;  %v561_v32 = vadd.f32 %v559_v26, %v1347_v61  ;;  %v540_v35 = vsel %vm274_vm1, %v534_v20, %v536_v19  ;;  %v531_v36 = vperm.slane %v529_v13, 0 }
 0x17c   : > { %v552_v38 = vmul.f32 %v548_v23, %v540_v35  ;;  %v541_v40 = vsel %vm274_vm1, %v535_v27, %v537_v28  ;;  %v538_v41 = vsel %vm274_vm1, %v530_v29, %v532_v30  ;;  %v533_v42 = vperm.slane %v529_v13, 1 }
 0x17d   : > { %v553_v43 = vmul.f32 %v549_v24, %v541_v40  ;;  %v550_v44 = vmul.f32 %v548_v23, %v538_v41 }
 0x17e   : > { %v1389_v47 = vadd.f32 %v552_v38, %v1365_v37  ;;  %v539_v34 = vsel %vm274_vm1, %v531_v36, %v533_v42  ;;  %v583_v37 = vperm.slane %v581_v46, 0 }
 0x17f   : > { %v1393_v60 = vadd.f32 %v553_v43, %v1367_v39  ;;  %v1396_v61 = vadd.f32 %v550_v44, %v1355_v16  ;;  %v551_v48 = vmul.f32 %v549_v24, %v539_v34  ;;  %v1405_v39 = vadd.f32 %v524_v1, %v1374_v45  ;;  %v649_v45 = vld [vmem:[#allocation6 + $0x20] sm:$0x7] }
 0x180   : > { %v657_v12 = vrot.slane %v649_v45, 3 }
 0x181   : > { %v1399_v49 = vadd.f32 %v551_v48, %v1357_v21 }
 0x187   : > { %v576_v50 = vpop.permute.xlu1 %575 }
 0x188   : > { %v574_v18 = vpop.permute.xlu0 %573 }
 0x189   : > { %v578_v15 = vsel %vm577_vm4, %v574_v18, %v576_v50  ;;  %v579_v16 = vsel %vm577_vm4, %v576_v50, %v574_v18 }
 0x18a   : > { %v601_v53 = vsub.f32 %v578_v15, %v1405_v39  ;;  %v602_v21 = vsub.f32 %v579_v16, %v1402_v51  ;;  %v658_v16 = vsel %vm655_vm5, %v656_v4, %v657_v12 }
 0x18c   : > { %v603_v7 = vmul.f32 %v601_v53, %v583_v37  ;;  %v604_v57 = vmul.f32 %v602_v21, %v584_v17 }
 0x18e   : > { %v605_v59 = vmul.f32 0.5, %v603_v7  ;;  %v606_v62 = vmul.f32 0.5, %v604_v57  ;;  %v641_v63 = vmul.f32 %v603_v7, %v597_v55  ;;  %v642_v2 = vmul.f32 %v604_v57, %v598_v56 }
 0x18f   : > { %v623_v1 = vrot.slane %v603_v7, 4  ;;  %v624_v3 = vrot.slane %v604_v57, 4  ;;  %v645_v18 = vadd.f32 %v603_v7, %v1405_v39  ;;  %v646_v53 = vadd.f32 %v604_v57, %v1402_v51 }
 0x190   : > { %v607_v5 = vadd.f32 %v605_v59, %v1405_v39  ;;  %v608_v8 = vadd.f32 %v606_v62, %v1402_v51  ;;  %v643_v9 = vadd.f32 %v641_v63, %v564_v14  ;;  %v644_v6 = vadd.f32 %v642_v2, %v565_v22  ;;  %v648_v14 = vld [vmem:[#allocation6 + $0x18] sm:$0x80]  ;;  %v650_v22 = vld [vmem:[#allocation6 + $0x28] sm:$0x7]  ;;  %v684_v39 = vld [vmem:[#allocation8 + $0x10] sm:$0xff] }
 0x191   : > { %v627_v10 = vsel %vm274_vm1, %v603_v7, %v623_v1  ;;  %v628_v11 = vsel %vm274_vm1, %v604_v57, %v624_v3  ;;  %v659_v48 = vrot.slane %v648_v14, 3  ;;  %v660_v46 = vrot.slane %v650_v22, 3  ;;  %v682_v51 = vld [vmem:[#allocation8] sm:$0xff] }
 0x192   : > { %v637_v13 = vmul.f32 %v607_v5, %v590_v52  ;;  %v674_v23 = vrot.slane %v643_v9, 4  ;;  %v638_v24 = vmul.f32 %v608_v8, %v591_v58  ;;  %v675_v25 = vrot.slane %v644_v6, 4 }
 0x193   : > { %v613_v26 = vperm.slane %v607_v5, 2  ;;  %v615_v20 = vperm.slane %v607_v5, 3  ;;  %v614_v19 = vperm.slane %v608_v8, 2  ;;  %v616_v27 = vperm.slane %v608_v8, 3 }
 0x194   : > { %v639_v28 = vadd.f32 %v637_v13, %v560_v31  ;;  %v640_v29 = vadd.f32 %v638_v24, %v561_v32  ;;  %v609_v30 = vperm.slane %v607_v5, 0  ;;  %v611_v35 = vperm.slane %v607_v5, 1 }
 0x195   : > { %v619_v36 = vsel %vm274_vm1, %v613_v26, %v615_v20  ;;  %v620_v38 = vsel %vm274_vm1, %v614_v19, %v616_v27  ;;  %v610_v40 = vperm.slane %v608_v8, 0  ;;  %v612_v41 = vperm.slane %v608_v8, 1 }
 0x196   : > { %v678_v42 = vsel %vm274_vm1, %v639_v28, %v674_v23  ;;  %v679_v43 = vsel %vm274_vm1, %v640_v29, %v675_v25  ;;  %v631_v44 = vmul.f32 %v627_v10, %v619_v36  ;;  %v632_v34 = vmul.f32 %v628_v11, %v620_v38 }
 0x197   : > { %719 = vmatpush.msra.mxu0 %v678_v42  ;;  %909 = vmatpush.msra.mxu2 %v678_v42  ;;  %v617_v31 = vsel %vm274_vm1, %v609_v30, %v611_v35  ;;  %v618_v32 = vsel %vm274_vm1, %v610_v40, %v612_v41 }
 0x198   : > { %748 = vmatpush.msra.mxu1 %v679_v43  ;;  %913 = vmatpush.msra.mxu3 %v679_v43  ;;  %v635_v50 = vadd.f32 %v631_v44, %v1389_v47  ;;  %v636_v33 = vadd.f32 %v632_v34, %v1393_v60  ;;  %v629_v37 = vmul.f32 %v627_v10, %v617_v31 }
 0x199   : > { %v630_v17 = vmul.f32 %v628_v11, %v618_v32  ;;  %v661_v47 = vsel %vm655_vm5, %v659_v48, %v660_v46  ;;  %v664_v60 = vsel %vm274_vm1, %v645_v18, %v658_v16 }
 0x19a   : > { %720 = vmatpush.msra.mxu0 %v635_v50  ;;  %910 = vmatpush.msra.mxu2 %v635_v50  ;;  %v633_v15 = vadd.f32 %v629_v37, %v1396_v61  ;;  %v665_v61 = vsel %vm274_vm1, %v646_v53, %v661_v47 }
 0x19b   : > { %749 = vmatpush.msra.mxu1 %v636_v33  ;;  %914 = vmatpush.msra.mxu3 %v636_v33  ;;  %v634_v21 = vadd.f32 %v630_v17, %v1399_v49  ;;  %v685_v49 = vld [vmem:[#allocation8 + $0x18] sm:$0xff] }
 0x19c   : > { %721 = vmatpush.msra.mxu0 %v633_v15  ;;  %911 = vmatpush.msra.mxu2 %v633_v15 }
 0x19d   : > { %750 = vmatpush.msra.mxu1 %v634_v21  ;;  %915 = vmatpush.msra.mxu3 %v634_v21 }
 0x19e   : > { %722 = vmatpush.msra.mxu0 %v664_v60  ;;  %912 = vmatpush.msra.mxu2 %v664_v60 }
 0x19f   : > { %751 = vmatpush.msra.mxu1 %v665_v61  ;;  %916 = vmatpush.msra.mxu3 %v665_v61 }
 0x1a0   : > { %896 = vmatmul.msk.f32.vlgmr.msra.gmra.mxu2 %vm694_vm6, %v684_v39  ;;  %900 = vmatmul.msk.f32.vlgmr.msra.gmra.mxu3 %vm694_vm6, %v684_v39 }
 0x1a1   : > { %894 = vmatmul.msk.f32.vlgmr.msra.gmra.mxu0 %vm694_vm6, %v682_v51  ;;  %898 = vmatmul.msk.f32.vlgmr.msra.gmra.mxu1 %vm694_vm6, %v682_v51 }
 0x1a8   : > { %897 = vmatmul.msk.f32.gmra.mxu2 %vm694_vm6, %v685_v49  ;;  %901 = vmatmul.msk.f32.gmra.mxu3 %vm694_vm6, %v685_v49 }
 0x1a9   : > { %895 = vmatmul.msk.f32.gmra.mxu0 %vm694_vm6, %v683_v54  ;;  %899 = vmatmul.msk.f32.gmra.mxu1 %vm694_vm6, %v683_v54 }
 0x21e   : > { %v724_v55 = vpop.f32.mrf.mxu0  ;;  %v753_v56 = vpop.f32.mrf.mxu1 }
 0x21f   : > { %765 = vst [vmem:[%s221_s29] sm:$0xff] %v724_v55 }
 0x220   : > { %766 = vst [vmem:[%s221_s29 + $0x8] sm:$0xff] %v753_v56 }
 0x223   : > { %v730_v7 = vpop.f32.mrf.mxu2  ;;  %v759_v57 = vpop.f32.mrf.mxu3 }
 0x224   : > { %769 = vst [vmem:[%s221_s29 + $0x20] sm:$0xff] %v730_v7 }
 0x225   : > { %770 = vst [vmem:[%s221_s29 + $0x28] sm:$0xff] %v759_v57 }
 0x226   : > { %v727_v0 = vpop.f32.mrf.mxu0  ;;  %v756_v52 = vpop.f32.mrf.mxu1 }
 0x227   : > { %767 = vst [vmem:[%s221_s29 + $0x10] sm:$0xff] %v727_v0 }
 0x228   : > { %768 = vst [vmem:[%s221_s29 + $0x18] sm:$0xff] %v756_v52 }
 0x22b   : > { %v733_v58 = vpop.f32.mrf.mxu2  ;;  %v762_v59 = vpop.f32.mrf.mxu3 }
 0x22c   : > { %771 = vst [vmem:[%s221_s29 + $0x30] sm:$0xff] %v733_v58 }
 0x22d   : > { %772 = vst [vmem:[%s221_s29 + $0x38] sm:$0xff] %v762_v59 }
 0x22e   : > { %1112 = shalt.err (!%p1109_p9)
}
 0x22f   : > { %s1167_s16 = smov 256   ;;  %s1168_s26 = smov 512  }
 0x230   : > { %s1169_s27 = smov 16  }
 0x231   : > { %927 = dma.vmem_to_hbm [thread:$0]  (%p1259_p4), %s787_s8, 1024, %s789_s21, %s774_s19, %s1167_s16, %s1168_s26, %s1169_s27  }
 0x232 PF: > { %s803_s28 = sand.u32 1, %s1143_s12   ;;  %p1481_p10 = scmp.ge.s32.totalorder %s1155_s15, 2 }
 0x233   : > { %s804_s29 = scalar_lea.sflag [#allocation5], %s803_s28 }
 0x234   : > { %p941_p13 = pnand %p1481_p10, %p1263_p6 }
 0x236   : > { %p942_p11 = pneg %p941_p13 }
 0x238   : > { %1138 = dma.done.wait (%p942_p11), %s804_s29, 1024  }
 0x239   : > { %1140 = vsyncadd (%p942_p11), %s804_s29, 4294966272  ;;  %p17_p0 = scmp.ge.s32.totalorder %s1233_s6, 4   ;;  %s1482_s12 = smov %s1147_s13 }
 0x23a   : > { %s1483_s13 = smov %s1151_s14  ;;  %s1484_s14 = smov %s1244_s9 }
 0x23b   : > { %s1485_s15 = smov %s1233_s6  ;;  %19 = sbr.rel (!%p17_p0) target bundleno = 6 (0x6), region = 101 }
 0x240   :  { %810 = vsyncpa [#allocation4], 1 }
 0x241   :  { %812 = vsyncpa [#allocation4 + $0x1], 1 }
 0x242   :  { %813 = vsyncpa [#allocation7], 1 }
 0x243   :  { %814 = vsyncpa [#allocation5], 1 }
 0x244   :  { %816 = vsyncpa [#allocation5 + $0x1], 1 }

</bundles_post_ra>
